<compile_context>
chip_gen: v7x
topology: tpu7x:2x2x1
jax: 0.10.0
libtpu: 0.0.40
codegen_flags: <defaults>
</compile_context>

<pallas_src>
import jax
import jax.numpy as jnp
from jax.experimental import pallas as pl
from jax.experimental.pallas import tpu as pltpu

_H = 128      # hidden width fixed by the PyTorch module
_EPS = 1e-5   # BatchNorm1d default eps
_SUB = 8      # f32 sublane count


def _round_up(a, b):
    return (a + b - 1) // b * b


# ---------------- pass 1: Linear1 + per-tile partial BN statistics ----------------
def _stats_kernel(x_ref, w1t_ref, psum_ref, pssq_ref):
    # Linear 1 (bias dropped: cancelled exactly by the train-mode BatchNorm below).
    h = jnp.dot(x_ref[...].astype(jnp.bfloat16), w1t_ref[...],
                preferred_element_type=jnp.float32)                 # (TN, H) f32
    # Keep the per-tile reduction on the VPU: fold rows into 8 sublane groups
    # (pure elementwise adds); the final 8->1 cross-sublane reduce is done in
    # the wrapper on a tiny (num_tiles*8, 128) array.
    tn = h.shape[0]
    hg = h.reshape(tn // _SUB, _SUB, _H)
    psum_ref[...] = jnp.sum(hg, axis=0)
    pssq_ref[...] = jnp.sum(hg * hg, axis=0)


def _stats_kernel_store_h(x_ref, w1t_ref, h_ref, psum_ref, pssq_ref):
    h = jnp.dot(x_ref[...].astype(jnp.bfloat16), w1t_ref[...],
                preferred_element_type=jnp.float32)
    # bf16 h halves the dominant HBM round-trip; pass 2 feeds bf16 to the MXU anyway.
    h_ref[...] = h.astype(jnp.bfloat16)
    tn = h.shape[0]
    hg = h.reshape(tn // _SUB, _SUB, _H)
    psum_ref[...] = jnp.sum(hg, axis=0)
    pssq_ref[...] = jnp.sum(hg * hg, axis=0)


# ---------------- pass 2: BN affine + ReLU + Linear2 ----------------
def _apply_recompute_kernel(x_ref, w1t_ref, scale_ref, shift_ref, w2t_ref, b2_ref, o_ref):
    # Recompute x@W1 (cheap, hidden under DMA) instead of round-tripping h via HBM.
    h = jnp.dot(x_ref[...].astype(jnp.bfloat16), w1t_ref[...],
                preferred_element_type=jnp.float32)
    h = jnp.maximum(h * scale_ref[...] + shift_ref[...], 0.0)
    # TODO(synk): train-mode dropout mask not implemented; eval/identity semantics.
    out = jnp.dot(h.astype(jnp.bfloat16), w2t_ref[...],
                  preferred_element_type=jnp.float32) + b2_ref[...]
    o_ref[...] = out.astype(o_ref.dtype)


def _apply_from_h_kernel(h_ref, scale_ref, shift_ref, w2t_ref, b2_ref, o_ref):
    h = h_ref[...].astype(jnp.float32)
    h = jnp.maximum(h * scale_ref[...] + shift_ref[...], 0.0)
    # TODO(synk): train-mode dropout mask not implemented; eval/identity semantics.
    out = jnp.dot(h.astype(jnp.bfloat16), w2t_ref[...],
                  preferred_element_type=jnp.float32) + b2_ref[...]
    o_ref[...] = out.astype(o_ref.dtype)


def compress_fc(x, w1, b1, gamma, beta, w2, b2, *, block_n=None):
    """x: (N, idim); w1: (H, idim); w2: (odim, H) -- PyTorch Linear weight layout."""
    del b1  # cancelled exactly by the train-mode BatchNorm that follows Linear 1
    N, idim = x.shape
    H = w1.shape[0]
    odim = w2.shape[0]
    assert H == _H

    # ---- layout glue (wrapper side) ----
    w1t = jnp.transpose(w1).astype(jnp.bfloat16)                     # (idim, H)
    OP = _round_up(odim, 128)                                        # lane-dense output
    w2t = jnp.zeros((H, OP), jnp.bfloat16)
    w2t = w2t.at[:, :odim].set(jnp.transpose(w2).astype(jnp.bfloat16))
    b2p = jnp.zeros((1, OP), jnp.float32)
    b2p = b2p.at[:, :odim].set(b2.reshape(1, odim).astype(jnp.float32))

    # Small idim: re-reading x in pass 2 is cheaper than writing+reading h via HBM.
    recompute_h = idim <= _H

    # ---- generation-dependent VMEM budget ----
    try:
        phys_vmem = int(pltpu.get_tpu_info().vmem_capacity_bytes)
    except Exception:
        phys_vmem = 64 * 1024 * 1024                                 # v7x-safe fallback
    if phys_vmem >= 128 * 1024 * 1024:                               # v5e / v6e
        vmem_limit = 64 * 1024 * 1024
        default_block_n = 1024
    else:                                                            # v7x (64 MiB / TC)
        vmem_limit = 32 * 1024 * 1024
        default_block_n = 512
    if block_n is None:
        block_n = default_block_n

    # Resident (constant index_map) blocks are still double-buffered by Pallas:
    # budget them before solving for the row-tile size.
    resident = 2 * (idim * H * 2 + H * OP * 2 + (2 * H + OP) * 4)
    per_row = 4 * idim + 4 * OP + (0 if recompute_h else 4 * H)      # conservative streamed bytes/row
    budget = max(vmem_limit - resident - 2 * 1024 * 1024, 1 * 1024 * 1024)
    max_rows = max(16, (budget // (2 * per_row)) // 16 * 16)
    TN = int(min(block_n, max_rows, _round_up(N, 16)))
    TN = max(16, TN // 16 * 16)                                      # bf16 sublane packing

    Npad = _round_up(N, TN)
    if Npad != N:
        # zero rows contribute 0 to sum/sumsq (no bias); stats divide by true N
        x = jnp.zeros((Npad, idim), x.dtype).at[:N, :].set(x)
    num_tiles = Npad // TN

    # NOTE: if xprof ever shows exposed DMA in pass 1 (tiny idim), bump the x
    # BlockSpec to pipeline_mode=pl.Buffered(3) per review (not applied by default).

    # ---- pass 1: Linear1 + per-tile partial BN statistics ("parallel" axis) ----
    stat_out_spec = pl.BlockSpec((_SUB, H), lambda i: (i, 0))
    stat_shape = jax.ShapeDtypeStruct((num_tiles * _SUB, H), jnp.float32)
    if recompute_h:
        psum, pssq = pl.pallas_call(
            _stats_kernel,
            out_shape=(stat_shape, stat_shape),
            grid_spec=pltpu.PrefetchScalarGridSpec(
                num_scalar_prefetch=0,
                grid=(num_tiles,),
                in_specs=[pl.BlockSpec((TN, idim), lambda i: (i, 0)),
                          pl.BlockSpec((idim, H), lambda i: (0, 0))],
                out_specs=[stat_out_spec, stat_out_spec]),
            compiler_params=pltpu.CompilerParams(
                dimension_semantics=("parallel",),
                vmem_limit_bytes=vmem_limit),
        )(x, w1t)
        h_bf16 = None
    else:
        h_bf16, psum, pssq = pl.pallas_call(
            _stats_kernel_store_h,
            out_shape=(jax.ShapeDtypeStruct((Npad, H), jnp.bfloat16),
                       stat_shape, stat_shape),
            grid_spec=pltpu.PrefetchScalarGridSpec(
                num_scalar_prefetch=0,
                grid=(num_tiles,),
                in_specs=[pl.BlockSpec((TN, idim), lambda i: (i, 0)),
                          pl.BlockSpec((idim, H), lambda i: (0, 0))],
                out_specs=[pl.BlockSpec((TN, H), lambda i: (i, 0)),
                           stat_out_spec, stat_out_spec]),
            compiler_params=pltpu.CompilerParams(
                dimension_semantics=("parallel",),
                vmem_limit_bytes=vmem_limit),
        )(x, w1t)

    # ---- tiny stat fold in the wrapper: (num_tiles*8, 128) -> (128,) ----
    inv_n = 1.0 / float(N)
    mean = jnp.sum(psum, axis=0) * inv_n
    # TODO(synk): E[h^2]-E[h]^2 can cancel catastrophically when |mean| >> std;
    # clamp prevents NaN but a shifted/Welford accumulation would be more robust.
    var = jnp.maximum(jnp.sum(pssq, axis=0) * inv_n - mean * mean, 0.0)   # biased (train-mode BN)
    scale_v = gamma.astype(jnp.float32) * jax.lax.rsqrt(var + _EPS)        # fold gamma
    shift_v = beta.astype(jnp.float32) - mean * scale_v
    scale = scale_v.reshape(1, H)
    shift = shift_v.reshape(1, H)

    # ---- pass 2: normalize + ReLU + Linear2 (independent row tiles -> parallel) ----
    common_tail_specs = [pl.BlockSpec((1, H), lambda i: (0, 0)),
                         pl.BlockSpec((1, H), lambda i: (0, 0)),
                         pl.BlockSpec((H, OP), lambda i: (0, 0)),
                         pl.BlockSpec((1, OP), lambda i: (0, 0))]
    if recompute_h:
        out_padded = pl.pallas_call(
            _apply_recompute_kernel,
            out_shape=jax.ShapeDtypeStruct((Npad, OP), x.dtype),
            grid_spec=pltpu.PrefetchScalarGridSpec(
                num_scalar_prefetch=0,
                grid=(num_tiles,),
                in_specs=[pl.BlockSpec((TN, idim), lambda i: (i, 0)),
                          pl.BlockSpec((idim, H), lambda i: (0, 0))] + common_tail_specs,
                out_specs=pl.BlockSpec((TN, OP), lambda i: (i, 0))),
            compiler_params=pltpu.CompilerParams(
                dimension_semantics=("parallel",),
                vmem_limit_bytes=vmem_limit),
        )(x, w1t, scale, shift, w2t, b2p)
    else:
        out_padded = pl.pallas_call(
            _apply_from_h_kernel,
            out_shape=jax.ShapeDtypeStruct((Npad, OP), x.dtype),
            grid_spec=pltpu.PrefetchScalarGridSpec(
                num_scalar_prefetch=0,
                grid=(num_tiles,),
                in_specs=[pl.BlockSpec((TN, H), lambda i: (i, 0))] + common_tail_specs,
                out_specs=pl.BlockSpec((TN, OP), lambda i: (i, 0))),
            compiler_params=pltpu.CompilerParams(
                dimension_semantics=("parallel",),
                vmem_limit_bytes=vmem_limit),
        )(h_bf16, scale, shift, w2t, b2p)

    return out_padded[:N, :odim]


def _reference(x, w1, b1, gamma, beta, w2, b2):
    h = x @ w1.T + b1
    mean = h.mean(axis=0, keepdims=True)
    var = ((h - mean) ** 2).mean(axis=0, keepdims=True)
    h = (h - mean) / jnp.sqrt(var + 1e-5) * gamma + beta
    h = jnp.maximum(h, 0.0)
    return h @ w2.T + b2


def _make_params(key, idim, odim, H):
    k1, kb1, k2, kb2 = jax.random.split(key, 4)
    lim1 = 1.0 / jnp.sqrt(idim)
    w1 = jax.random.uniform(k1, (H, idim), minval=-lim1, maxval=lim1, dtype=jnp.float32)
    b1 = jax.random.uniform(kb1, (H,), minval=-lim1, maxval=lim1, dtype=jnp.float32)
    gamma = jnp.ones((H,), jnp.float32)
    beta = jnp.zeros((H,), jnp.float32)
    lim2 = 1.0 / jnp.sqrt(H)
    w2 = jax.random.uniform(k2, (odim, H), minval=-lim2, maxval=lim2, dtype=jnp.float32)
    b2 = jax.random.uniform(kb2, (odim,), minval=-lim2, maxval=lim2, dtype=jnp.float32)
    return w1, b1, gamma, beta, w2, b2


if __name__ == "__main__":
    H = 128
    key = jax.random.PRNGKey(0)
    kx1, kp1, kx2, kp2 = jax.random.split(key, 4)

    # Case 1: small idim -> recompute-h path.  N=20 with block_n=16 exercises
    # multiple row tiles, per-tile partial BN stats, row padding, lane-padded output.
    N1, idim1, odim1 = 20, 32, 16
    x1 = jax.random.normal(kx1, (N1, idim1), dtype=jnp.float32)
    p1 = _make_params(kp1, idim1, odim1, H)
    out1 = compress_fc(x1, *p1, block_n=16)
    out1 = jax.block_until_ready(out1)
    ref1 = _reference(x1, *p1)
    assert out1.shape == (N1, odim1)
    assert jnp.allclose(out1, ref1, atol=5e-2, rtol=5e-2), "mismatch vs reference (recompute path)"

    # Case 2: idim > 128 -> bf16-h streaming path.
    N2, idim2, odim2 = 20, 256, 16
    x2 = jax.random.normal(kx2, (N2, idim2), dtype=jnp.float32)
    p2 = _make_params(kp2, idim2, odim2, H)
    out2 = compress_fc(x2, *p2, block_n=16)
    out2 = jax.block_until_ready(out2)
    ref2 = _reference(x2, *p2)
    assert out2.shape == (N2, odim2)
    assert jnp.allclose(out2, ref2, atol=5e-2, rtol=5e-2), "mismatch vs reference (bf16-h path)"

    print("KERNEL_OK")
</pallas_src>

<mosaic_0001>
module attributes {stable_mosaic.version = 11 : i64} {
  func.func @_stats_kernel(%arg0: i32, %arg1: memref<16x32xf32, #tpu.memory_space<vmem>>, %arg2: memref<32x128xbf16, #tpu.memory_space<vmem>>, %arg3: memref<8x128xf32, #tpu.memory_space<vmem>>, %arg4: memref<8x128xf32, #tpu.memory_space<vmem>>) attributes {dimension_semantics = [#tpu.dimension_semantics<parallel>], iteration_bounds = array<i64: 2>, scalar_prefetch = 0 : i64, scratch_operands = 0 : i64, tpu.core_type = #tpu.core_type<tc>, window_params = [{transform_indices = @transform_0, window_bounds = array<i64: 16, 32>}, {pipeline_mode = #tpu.pipeline_mode<synchronous>, transform_indices = @transform_1, window_bounds = array<i64: 32, 128>}, {transform_indices = @transform_2, window_bounds = array<i64: 8, 128>}, {transform_indices = @transform_3, window_bounds = array<i64: 8, 128>}]} {
    %c0 = arith.constant 0 : index
    %c0_0 = arith.constant 0 : index
    %0 = vector.load %arg1[%c0, %c0_0] : memref<16x32xf32, #tpu.memory_space<vmem>>, vector<16x32xf32>
    %1 = arith.truncf %0 : vector<16x32xf32> to vector<16x32xbf16>
    %c0_1 = arith.constant 0 : index
    %c0_2 = arith.constant 0 : index
    %2 = vector.load %arg2[%c0_1, %c0_2] : memref<32x128xbf16, #tpu.memory_space<vmem>>, vector<32x128xbf16>
    %cst = arith.constant dense<0.000000e+00> : vector<16x128xf32>
    %3 = tpu.matmul %1, %2, %cst {dimension_numbers = #tpu.dot_dimension_numbers<[1], [0], [0], [1], [0, 0, 1, 1], [], []>} : vector<16x32xbf16>, vector<32x128xbf16>, vector<16x128xf32> -> vector<16x128xf32>
    %4 = vector.shape_cast %3 : vector<16x128xf32> to vector<2x8x128xf32>
    %cst_3 = arith.constant dense<0.000000e+00> : vector<8x128xf32>
    %5 = vector.multi_reduction <add>, %4, %cst_3 [0] : vector<2x8x128xf32> to vector<8x128xf32>
    %c0_4 = arith.constant 0 : index
    %c0_5 = arith.constant 0 : index
    %6 = vector.load %arg3[%c0_4, %c0_5] : memref<8x128xf32, #tpu.memory_space<vmem>>, vector<8x128xf32>
    tpu.vector_store %arg3[%c0_4, %c0_5], %5 {strides = array<i32>} : memref<8x128xf32, #tpu.memory_space<vmem>>, vector<8x128xf32>,
    %7 = arith.mulf %4, %4 : vector<2x8x128xf32>
    %cst_6 = arith.constant dense<0.000000e+00> : vector<8x128xf32>
    %8 = vector.multi_reduction <add>, %7, %cst_6 [0] : vector<2x8x128xf32> to vector<8x128xf32>
    %c0_7 = arith.constant 0 : index
    %c0_8 = arith.constant 0 : index
    %9 = vector.load %arg4[%c0_7, %c0_8] : memref<8x128xf32, #tpu.memory_space<vmem>>, vector<8x128xf32>
    tpu.vector_store %arg4[%c0_7, %c0_8], %8 {strides = array<i32>} : memref<8x128xf32, #tpu.memory_space<vmem>>, vector<8x128xf32>,
    return
  }
  func.func @transform_0(%arg0: i32) -> (i32, i32) {
    %c0_i32 = arith.constant 0 : i32
    %c0_i32_0 = arith.constant 0 : i32
    return %arg0, %c0_i32 : i32, i32
  }
  func.func @transform_1(%arg0: i32) -> (i32, i32) {
    %c0_i32 = arith.constant 0 : i32
    %c0_i32_0 = arith.constant 0 : i32
    %c0_i32_1 = arith.constant 0 : i32
    return %c0_i32, %c0_i32_0 : i32, i32
  }
  func.func @transform_2(%arg0: i32) -> (i32, i32) {
    %c0_i32 = arith.constant 0 : i32
    %c0_i32_0 = arith.constant 0 : i32
    return %arg0, %c0_i32 : i32, i32
  }
  func.func @transform_3(%arg0: i32) -> (i32, i32) {
    %c0_i32 = arith.constant 0 : i32
    %c0_i32_0 = arith.constant 0 : i32
    return %arg0, %c0_i32 : i32, i32
  }
}

</mosaic_0001>

<bundles_post_ra>
// kernel: tpu_custom_call.1
= control target key start
LH: loop header
LB: loop body
LE: loop exit
PB: predicated region body
PF: predicated region fallthrough
CT: control target
= control target key end

     0   :  { %9 = vsyncpa [#allocation3], 0  ;;  %s959_s0 = inlined_call_operand.hbm [shape: f32[32,32], index: 0, kind: input, shape index: {}]   ;;  %s960_s1 = inlined_call_operand.hbm [shape: bf16[32,128], index: 1, kind: input, shape index: {}]   ;;  %s961_s2 = inlined_call_operand.hbm [shape: f32[16,128], index: 2, kind: output, shape index: {0}]   ;;  %s962_s3 = inlined_call_operand.hbm [shape: f32[16,128], index: 3, kind: output, shape index: {1}]  }
   0x1   :  { %11 = vsyncpa [#allocation3 + $0x1], 0 }
   0x2   :  { %12 = vsyncpa [#allocation6], 0 }
   0x3   :  { %13 = vsyncpa [#allocation4], 0 }
   0x4   :  { %15 = vsyncpa [#allocation4 + $0x1], 0 }
   0x5   :  { %16 = vsyncpa [#allocation9], 0 }
   0x6   :  { %18 = vsyncpa [#allocation9 + $0x1], 0  ;;  %s726_s12 = smov 0   ;;  %s728_s13 = smov 0  }
   0x7   :  { %s730_s14 = smov 0   ;;  %s732_s15 = smov 0  }
   0x8 LB: > { %s747_s16 = sadd.s32 4294967295, %s694_s15   ;;  %s431_s17 = sadd.s32 4294967294, %s694_s15   ;;  %s694_s15 = sphi %s732_s15, %s982_s15   ;;  %s690_s14 = sphi %s730_s14, %s981_s14   ;;  %s686_s13 = sphi %s728_s13, %s980_s13   ;;  %s682_s12 = sphi %s726_s12, %s979_s12  }
   0x9   : > { %p44_p0 = scmp.ne.s32.totalorder %s686_s13, %s682_s12  ;;  %p963_p1 = scmp.eq.s32.totalorder %s747_s16, 0 }
   0xa   : > { %p95_p3 = scmp.eq.s32.totalorder %s431_s17, 1  ;;  %p432_p5 = scmp.ge.s32.totalorder %s694_s15, 1 }
   0xb   : > { %p756_p4 = por %p963_p1, %p44_p0  ;;  %p128_p7 = scmp.lt.s32.totalorder %s694_s15, 3 }
   0xc   : > { %p761_p6 = por %p95_p3, %p44_p0  ;;  %s696_s21 = smov [#allocation5]  }
   0xd   : > { %s966_s18 = scalar_select %p756_p4, 1, 0 }
   0xe   : > { %s967_s19 = scalar_select %p761_p6, 1, 0 }
   0xf   : > { %p766_p8 = pnand %p432_p5, %p128_p7  ;;  %s140_s22 = sshll.u32 %s696_s21, 4  ;;  %s770_s22 = int_to_ptr.vmem [resolvable:$true] %s140_s22 }
  0x10   : > { %s782_s24 = sadd.s32 1, %s694_s15   ;;  %s31_s25 = sadd.s32 1, %s690_s14 }
  0x11   : > { %s968_s20 = scalar_select %p766_p8, 1, 0 }
  0x12   : > { %p474_p9 = pneg %p766_p8  ;;  %s28_s26 = ssub.s32 %s694_s15, %s782_s24 }
  0x13   : > { %s534_s29 = scalar_lea.hbm %s960_s1, 256 }
  0x14   : > { %p777_p11 = pnand %p474_p9, %p963_p1  ;;  %p535_p12 = scmp.ne.s32.totalorder %s960_s1, %s534_s29 }
  0x15   : > { %p541_p5 = scmp.lt.u32.totalorder %s534_s29, %s960_s1 }
  0x16   : > { %p536_p13 = pneg %p777_p11 }
  0x18   : > { %p537_p0 = pnand %p536_p13, %p535_p12 }
  0x1a   : > { %p538_p3 = pneg %p537_p0 }
  0x1c   : > { %p543_p7 = pnand %p541_p5, %p538_p3 }
  0x1e   : > { %546 = shalt.err (!%p543_p7)
}
  0x1f   : > { %s547_s7 = scalar_lea.vmem %s770_s22, 256  ;;  %p555_p2 = scmp.lt.s32.totalorder %s770_s22, %s770_s22 }
  0x20   : > { %p548_p9 = scmp.ne.s32.totalorder %s770_s22, %s547_s7  ;;  %p556_p6 = scmp.lt.s32.totalorder %s547_s7, %s547_s7 }
  0x22   : > { %p550_p10 = pnand %p548_p9, %p536_p13  ;;  %p557_p4 = por %p556_p6, %p555_p2 }
  0x24   : > { %p551_p1 = pneg %p550_p10 }
  0x26   : > { %p558_p8 = pnand %p557_p4, %p551_p1 }
  0x28   : > { %561 = shalt.err (!%p558_p8)
}
  0x29   : > { %s697_s8 = smov 64   ;;  %s698_s9 = smov 4  }
  0x2a   : > { %477 = dma.hbm_to_vmem [thread:$0]  (!%p777_p11), %s960_s1, 256, %s770_s22, [#allocation6], %s697_s8, %s697_s8, %s698_s9  }
  0x2b   : > { %p29_p2 = scmp.eq.s32.totalorder %s28_s26, 0  ;;  %p38_p1 = scmp.ne.s32.totalorder %s690_s14, %s686_s13 }
  0x2c   : > { %p39_p4 = scmp.eq.s32.totalorder %s694_s15, 0  ;;  %p490_p6 = scmp.lt.s32.totalorder %s694_s15, 2 }
  0x2d   : > { %s813_s17 = scalar_select %p29_p2, %s690_s14, %s31_s25  }
  0x2e   : > { %p40_p8 = por %p39_p4, %p38_p1  ;;  %p970_p10 = scmp.eq.s32.totalorder %s747_s16, 1 }
  0x2f   : > { %s154_s27 = sand.u32 1, %s690_s14   ;;  %s452_s28 = sshll.u32 %s694_s15, 8 }
  0x30   : > { %p817_p12 = por %p970_p10, %p38_p1  ;;  %s435_s29 = sshll.u32 %s154_s27, 4 }
  0x31   : > { %s826_s4 = scalar_lea.hbm %s959_s0, %s452_s28  ;;  %s158_s22 = scalar_lea.vmem [#allocation2], %s435_s29 }
  0x32   : > { %s165_s25 = sshll.u32 %s158_s22, 4  ;;  %p828_p11 = pnand %p490_p6, %p40_p8  ;;  %s832_s25 = int_to_ptr.vmem [resolvable:$true] %s165_s25 }
  0x33   : > { %s834_s5 = scalar_lea.sflag [#allocation3], %s154_s27  ;;  %s562_s6 = scalar_lea.hbm %s826_s4, 256 }
  0x34   : > { %p563_p13 = scmp.ne.s32.totalorder %s826_s4, %s562_s6  ;;  %p564_p0 = pneg %p828_p11 }
  0x35   : > { %s567_s9 = scalar_lea.hbm %s959_s0, 512  ;;  %p568_p7 = scmp.lt.u32.totalorder %s826_s4, %s959_s0 }
  0x36   : > { %p565_p3 = pnand %p564_p0, %p563_p13  ;;  %p569_p9 = scmp.lt.u32.totalorder %s567_s9, %s562_s6 }
  0x37   : > { %p571_p1 = scmp.lt.u32.totalorder %s562_s6, %s826_s4 }
  0x38   : > { %p566_p5 = pneg %p565_p3  ;;  %p570_p2 = por %p569_p9, %p568_p7 }
  0x3a   : > { %p572_p4 = por %p571_p1, %p570_p2 }
  0x3c   : > { %p573_p6 = pnand %p572_p4, %p566_p5 }
  0x3e   : > { %576 = shalt.err (!%p573_p6)
}
  0x3f   : > { %s577_s27 = scalar_lea.vmem %s832_s25, 256  ;;  %s699_s28 = smov [#allocation2]  }
  0x40   : > { %p578_p8 = scmp.ne.s32.totalorder %s832_s25, %s577_s27  ;;  %s582_s29 = sshll.u32 %s699_s28, 4  ;;  %s583_s29 = int_to_ptr.vmem [resolvable:$false] %s582_s29 }
  0x41   : > { %s584_s23 = scalar_lea.vmem %s583_s29, 512  ;;  %p585_p3 = scmp.lt.s32.totalorder %s832_s25, %s583_s29 }
  0x42   : > { %p580_p10 = pnand %p578_p8, %p564_p0  ;;  %p586_p7 = scmp.lt.s32.totalorder %s584_s23, %s577_s27 }
  0x44   : > { %p581_p13 = pneg %p580_p10  ;;  %p587_p9 = por %p586_p7, %p585_p3 }
  0x46   : > { %p588_p2 = pnand %p587_p9, %p581_p13 }
  0x48   : > { %591 = shalt.err (!%p588_p2)
}
  0x49   : > { %s700_s30 = smov 128   ;;  %s701_s22 = smov 8  }
  0x4a   : > { %481 = dma.hbm_to_vmem [thread:$0]  (!%p828_p11), %s826_s4, 256, %s832_s25, %s834_s5, %s700_s30, %s700_s30, %s701_s22  }
  0x4b   : > { %p973_p0 = scmp.ne.s32.totalorder %s968_s20, 0 }
  0x4c   : > { %s865_s6 = sand.u32 (!%p973_p0), 1, %s686_s13   ;;  %p974_p5 = scmp.ne.s32.totalorder (!%p973_p0), %s966_s18, 0 }
  0x4d   : > { %177 = sbr.rel (%p973_p0) target bundleno = 350 (0x15e), region = 28  ;;  %s439_s7 = sshll.u32 (!%p973_p0), %s865_s6, 4 }
  0x4e   : > { %s180_s8 = scalar_lea.sflag (!%p973_p0), [#allocation3], %s865_s6  ;;  %s183_s9 = scalar_lea.vmem (!%p973_p0), [#allocation2], %s439_s7 }
  0x54   : > { %665 = dma.done.wait (%p974_p5), %s180_s8, 256  }
  0x55   : > { %667 = vsyncadd (%p974_p5), %s180_s8, 4294967040  ;;  %p975_p1 = scmp.eq.s32.totalorder %s747_s16, 0 }
  0x57   : > { %669 = dma.done.wait (%p975_p1), [#allocation6], 256   ;;  %p976_p11 = pmov %p975_p1 }
  0x58   : > { %v702_v0 = vmov 0.0   ;;  %vm703_vm0 = vmmov 0   ;;  %v532_v1 = vld [vmem:[#allocation5] sm:$0xff]   ;;  %v533_v2 = vld [vmem:[#allocation5 + $0x8] sm:$0xff]   ;;  %vm236_vm1 = vcmask 261120   ;;  %s441_s18 = sshll.u32 %s865_s6, 3 }
  0x59   : > { %671 = vsyncadd (%p976_p11), [#allocation6], 4294967040  ;;  %456 = vmatprep.subr.bf16.mxu0 %v702_v0  ;;  %460 = vmatprep.mubr.msk.bf16.mxu0 %vm703_vm0, %v702_v0  ;;  %v217_v3 = vld [vmem:[%s183_s9] sm:$0xff]  ;;  %v218_v4 = vld [vmem:[%s183_s9 + $0x8] sm:$0xff]  ;;  %s448_s20 = sshll.u32 %s747_s16, 7  ;;  %s207_s4 = scalar_lea.vmem [#allocation7], %s441_s18 }
  0x5a   : > { %457 = vmatpush3.bf16.msra.mxu0 %v532_v1  ;;  %v219_v5 = vpack.c.bf16 %v218_v4, %v217_v3  ;;  %s306_s25 = sshll.u32 %s207_s4, 4  ;;  %s879_s26 = scalar_lea.vmem [#allocation8], %s441_s18  ;;  %s887_s25 = int_to_ptr.vmem [resolvable:$true] %s306_s25 }
  0x5b   : > { %458 = vmatprep.subr.bf16.mxu0 %v702_v0  ;;  %s319_s5 = sshll.u32 %s879_s26, 4  ;;  %s885_s27 = scalar_lea.hbm %s961_s2, %s448_s20  ;;  %s894_s5 = int_to_ptr.vmem [resolvable:$true] %s319_s5 }
  0x5c   : > { %s892_s29 = scalar_lea.hbm %s962_s3, %s448_s20  ;;  %s288_s23 = scalar_lea.sflag [#allocation4], %s865_s6 }
  0x5d   : > { %s592_s30 = scalar_lea.vmem %s887_s25, 128  ;;  %s704_s22 = smov [#allocation7]  }
  0x5e   : > { %459 = vmatpush3.bf16.msra.mxu0 %v533_v2  ;;  %p593_p4 = scmp.ne.s32.totalorder %s887_s25, %s592_s30  ;;  %s596_s7 = sshll.u32 %s704_s22, 4  ;;  %s597_s7 = int_to_ptr.vmem [resolvable:$false] %s596_s7 }
  0x5f   : > { %s598_s8 = scalar_lea.vmem %s597_s7, 256  ;;  %p599_p10 = scmp.lt.s32.totalorder %s887_s25, %s597_s7 }
  0x60   : > { %p594_p6 = pnand %p593_p4, %p817_p12  ;;  %p600_p13 = scmp.lt.s32.totalorder %s598_s8, %s592_s30 }
  0x61   : > { %461 = vmatmul.mubr.msk.bf16.vlgmr.msra.gmra.mrb[0].mxu0 %vm236_vm1, %v219_v5 }
  0x62   : > { %p595_p8 = pneg %p594_p6  ;;  %p601_p3 = por %p600_p13, %p599_p10 }
  0x64   : > { %p602_p7 = pnand %p601_p3, %p595_p8 }
 0x134   : > { %v274_v6 = vpop.f32.mrb[0].mxu0 }
 0x135   : > { %v462_v7 = vpop.f32.mrb[1].mxu0  ;;  %v283_v9 = vmul.f32 %v274_v6, %v274_v6 }
 0x136   : > { %v277_v8 = vpop.f32.mrb[2].mxu0 }
 0x137   : > { %v281_v10 = vadd.f32 %v277_v8, %v274_v6  ;;  %v284_v11 = vmul.f32 %v277_v8, %v277_v8  ;;  %v463_v12 = vpop.f32.mrb[3].mxu0 }
 0x139   : > { %v285_v13 = vadd.f32 %v284_v11, %v283_v9  ;;  %282 = vst [vmem:[%s207_s4] sm:$0xff] %v281_v10 }
 0x13a   : > { %605 = shalt.err (!%p602_p7)
}
 0x13b   : > { %s606_s9 = scalar_lea.hbm %s885_s27, 128  ;;  %s610_s4 = scalar_lea.hbm %s961_s2, 256 }
 0x13c   : > { %p607_p9 = scmp.ne.s32.totalorder %s885_s27, %s606_s9  ;;  %p611_p5 = scmp.lt.u32.totalorder %s885_s27, %s961_s2 }
 0x13d   : > { %p612_p1 = scmp.lt.u32.totalorder %s610_s4, %s606_s9  ;;  %p614_p4 = scmp.lt.u32.totalorder %s606_s9, %s885_s27 }
 0x13e   : > { %p608_p2 = pnand %p607_p9, %p817_p12 }
 0x13f   : > { %p613_p11 = por %p612_p1, %p611_p5 }
 0x140   : > { %p609_p0 = pneg %p608_p2 }
 0x141   : > { %p615_p6 = por %p614_p4, %p613_p11 }
 0x143   : > { %p616_p8 = pnand %p615_p6, %p609_p0 }
 0x145   : > { %619 = shalt.err (!%p616_p8)
}
 0x146   : > { %470 = dma.vmem_to_hbm [thread:$0]  (%p817_p12), %s887_s25, 128, %s885_s27, %s288_s23   ;;  %286 = vst [vmem:[%s879_s26] sm:$0xff] %v285_v13 }
 0x147   : > { %s293_s16 = scalar_lea.sflag [#allocation9], %s865_s6  ;;  %s620_s28 = scalar_lea.vmem %s894_s5, 128 }
 0x148   : > { %p621_p10 = scmp.ne.s32.totalorder %s894_s5, %s620_s28  ;;  %s705_s30 = smov [#allocation8]  }
 0x149   : > { %s624_s22 = sshll.u32 %s705_s30, 4  ;;  %s625_s22 = int_to_ptr.vmem [resolvable:$false] %s624_s22 }
 0x14a   : > { %p622_p13 = pnand %p621_p10, %p817_p12  ;;  %s626_s7 = scalar_lea.vmem %s625_s22, 256 }
 0x14b   : > { %p627_p7 = scmp.lt.s32.totalorder %s894_s5, %s625_s22  ;;  %p628_p9 = scmp.lt.s32.totalorder %s626_s7, %s620_s28 }
 0x14c   : > { %p623_p3 = pneg %p622_p13 }
 0x14d   : > { %p629_p2 = por %p628_p9, %p627_p7 }
 0x14f   : > { %p630_p0 = pnand %p629_p2, %p623_p3 }
 0x151   : > { %633 = shalt.err (!%p630_p0)
}
 0x152   : > { %s634_s6 = scalar_lea.hbm %s892_s29, 128  ;;  %s638_s27 = scalar_lea.hbm %s962_s3, 256 }
 0x153   : > { %p635_p5 = scmp.ne.s32.totalorder %s892_s29, %s634_s6  ;;  %p639_p4 = scmp.lt.u32.totalorder %s892_s29, %s962_s3 }
 0x154   : > { %p640_p6 = scmp.lt.u32.totalorder %s638_s27, %s634_s6  ;;  %p642_p10 = scmp.lt.u32.totalorder %s634_s6, %s892_s29 }
 0x155   : > { %p636_p1 = pnand %p635_p5, %p817_p12 }
 0x156   : > { %p641_p8 = por %p640_p6, %p639_p4 }
 0x157   : > { %p637_p11 = pneg %p636_p1 }
 0x158   : > { %p643_p13 = por %p642_p10, %p641_p8 }
 0x15a   : > { %p644_p3 = pnand %p643_p13, %p637_p11 }
 0x15c   : > { %647 = shalt.err (!%p644_p3)
}
 0x15d   : > { %471 = dma.vmem_to_hbm [thread:$0]  (%p817_p12), %s894_s5, 128, %s892_s29, %s293_s16  }
 0x15e PF: > { %s331_s9 = sand.u32 1, %s682_s12   ;;  %p977_p7 = scmp.ne.s32.totalorder %s967_s19, 0 }
 0x15f   : > { %p978_p9 = scmp.ge.s32.totalorder %s694_s15, 2  ;;  %s332_s18 = scalar_lea.sflag [#allocation4], %s331_s9 }
 0x161   : > { %p483_p2 = pnand %p978_p9, %p977_p7 }
 0x163   : > { %673 = dma.done.wait (!%p483_p2), %s332_s18, 128  }
 0x164   : > { %675 = vsyncadd (!%p483_p2), %s332_s18, 4294967168  ;;  %s341_s20 = scalar_lea.sflag [#allocation9], %s331_s9 }
 0x165   : > { %677 = dma.done.wait (!%p483_p2), %s341_s20, 128  }
 0x166   : > { %679 = vsyncadd (!%p483_p2), %s341_s20, 4294967168  ;;  %p21_p12 = scmp.ge.s32.totalorder %s782_s24, 4   ;;  %s979_s12 = smov %s686_s13 }
 0x167   : > { %s980_s13 = smov %s690_s14  ;;  %s981_s14 = smov %s813_s17 }
 0x168   : > { %s982_s15 = smov %s782_s24  ;;  %23 = sbr.rel (!%p21_p12) target bundleno = 8 (0x8), region = 94 }
 0x16f   :  { %346 = vsyncpa [#allocation3], 1 }
 0x170   :  { %348 = vsyncpa [#allocation3 + $0x1], 1 }
 0x171   :  { %349 = vsyncpa [#allocation6], 1 }
 0x172   :  { %350 = vsyncpa [#allocation4], 1 }
 0x173   :  { %352 = vsyncpa [#allocation4 + $0x1], 1 }
 0x174   :  { %353 = vsyncpa [#allocation9], 1 }
 0x175   :  { %355 = vsyncpa [#allocation9 + $0x1], 1 }

</bundles_post_ra>
